<compile_context>
chip_gen: v7x
topology: tpu7x:2x2x1
jax: 0.10.0
libtpu: 0.0.40
codegen_flags: <defaults>
</compile_context>

<pallas_src>
import jax
import jax.numpy as jnp
from jax.experimental import pallas as pl
from jax.experimental.pallas import tpu as pltpu


def _reid_passthrough_kernel(x_hbm, o_hbm, sem):
    # Pure pass-through: one whole-tensor HBM->HBM DMA handled by the DMA
    # engine at full HBM bandwidth; no VMEM staging, no VPU work.
    cp = pltpu.make_async_copy(x_hbm, o_hbm, sem)
    cp.start()
    cp.wait()


def reid_layer_forward(x, *, has_classify=True, validation=False):
    """Pallas implementation of ReIDLayer.forward.

    x: (N, C, H, W) feature map (NCHW, matching PyTorch).
    Returns x unchanged (identity). `validation` must be a static Python flag
    (it returns Python None, which is not traceable).
    """
    if validation:
        return None
    assert has_classify

    N, C, H, W = x.shape
    # Lane-dense 2D view: last dim C*H*W is a large multiple of 128.
    x2d = x.reshape(N, C * H * W)

    out2d = pl.pallas_call(
        _reid_passthrough_kernel,
        out_shape=jax.ShapeDtypeStruct(x2d.shape, x2d.dtype),
        in_specs=[pl.BlockSpec(memory_space=pl.ANY)],
        out_specs=pl.BlockSpec(memory_space=pl.ANY),
        scratch_shapes=[pltpu.SemaphoreType.DMA(())],
    )(x2d)

    return out2d.reshape(N, C, H, W)


def make_reid_params(n_obj_ids, key):
    """Deterministically build the classify head defined in __init__.

    Mirrors nn.Linear(128, n_obj_ids): weight (n_obj_ids, 128), bias (n_obj_ids,).
    # TODO(synk): these parameters (and the Softmax2d) are defined by __init__
    # but never used in forward(); materialized only for shape fidelity.
    """
    k_w, k_b = jax.random.split(key)
    bound = 1.0 / (128.0 ** 0.5)
    weight = jax.random.uniform(k_w, (n_obj_ids, 128), jnp.float32, -bound, bound)
    bias = jax.random.uniform(k_b, (n_obj_ids,), jnp.float32, -bound, bound)
    return {"classify.weight": weight, "classify.bias": bias}


if __name__ == "__main__":
    key = jax.random.PRNGKey(0)
    k_x, k_p = jax.random.split(key)

    # ReID embedding size is 128 (hard-coded via the module's Linear(128, ...)).
    N, C, H, W = 2, 128, 16, 16
    x = jax.random.normal(k_x, (N, C, H, W), dtype=jnp.float32)

    n_obj_ids = 10
    params = make_reid_params(n_obj_ids, k_p)  # unused in forward, by design

    out = reid_layer_forward(x, has_classify=True, validation=False)
    out = jax.block_until_ready(out)

    assert out.shape == x.shape and out.dtype == x.dtype
    assert bool(jnp.all(out == x))
    print("KERNEL_OK")
</pallas_src>

<mosaic_0001>
module attributes {stable_mosaic.version = 11 : i64} {
  func.func @_reid_passthrough_kernel(%arg0: memref<2x32768xf32, #tpu.memory_space<any>>, %arg1: memref<2x32768xf32, #tpu.memory_space<any>>, %arg2: memref<!tpu.dma_semaphore, #tpu.memory_space<semaphore_mem>>) attributes {dimension_semantics = [], scalar_prefetch = 0 : i64, scratch_operands = 1 : i64, tpu.core_type = #tpu.core_type<tc>} {
    tpu.enqueue_dma source(%arg0 : memref<2x32768xf32, #tpu.memory_space<any>>) target(%arg1 : memref<2x32768xf32, #tpu.memory_space<any>>) target_semaphore(%arg2 : memref<!tpu.dma_semaphore, #tpu.memory_space<semaphore_mem>>)
    tpu.wait_dma2 semaphore(%arg2 : memref<!tpu.dma_semaphore, #tpu.memory_space<semaphore_mem>>) src(%arg0 : memref<2x32768xf32, #tpu.memory_space<any>>) dst(%arg1 : memref<2x32768xf32, #tpu.memory_space<any>>)
    return
  }
}

</mosaic_0001>

<bundles_post_ra>
// kernel: tpu_custom_call.1
= control target key start
LH: loop header
LB: loop body
LE: loop exit
PB: predicated region body
PF: predicated region fallthrough
CT: control target
= control target key end

     0   :  { %s35_s6 = smov [#allocation2]   ;;  %s36_s7 = smov [#allocation3]   ;;  %s54_s0 = inlined_call_operand.hbm [shape: f32[2,32768], index: 0, kind: input, shape index: {}]   ;;  %s55_s1 = inlined_call_operand.hbm [shape: f32[2,32768], index: 1, kind: output, shape index: {}]  }
   0x1   :  { %s37_s8 = smov 0  }
   0x2   :  { %18 = dma.general %s54_s0, 8192, %s55_s1, %s35_s6, %s36_s7, [#allocation4], %s37_s8, 0  }
   0x3   :  { %33 = dma.done.wait [#allocation2], 8192 }
   0x4   :  { %34 = vsyncadd [#allocation2], 4294959104 }
   0x5   :  { %23 = vsyncmov [#allocation2] }
   0x8   :  { %s24_s13 = vpop.sfrf %23 }
   0x9   :  { %p29_p0 = scmp.ne.s32.totalorder %s24_s13, 0 }
   0xb   :  { %28 = shalt.err (%p29_p0)  }

</bundles_post_ra>
